<compile_context>
chip_gen: v7x
topology: tpu7x:2x2x1
jax: 0.10.0
libtpu: 0.0.40
codegen_flags: <defaults>
</compile_context>

<pallas_src>
import functools
import math

import jax
import jax.numpy as jnp
from jax.experimental import pallas as pl
from jax.experimental.pallas import tpu as pltpu


# ----------------------------------------------------------------------------
# Fully fused kernel: QKV projection + grouped-query causal attention + c_proj
# ----------------------------------------------------------------------------
def _fused_gqa_kernel(x_ref, wqkv_ref, bqkv_ref, wc_ref, bc_ref, o_ref, *,
                      n_head, kv_heads, head_dim):
    """One grid step == one batch element. Everything stays resident in VMEM."""
    T = x_ref.shape[1]
    C = x_ref.shape[2]
    kvf = kv_heads * head_dim
    qpk = n_head // kv_heads
    scale = 1.0 / math.sqrt(head_dim)
    trans_b = (((1,), (1,)), ((), ()))   # a @ b.T without materializing b.T

    x = x_ref[0]                                                  # [T, C]

    # ---- fused QKV projection: single MXU matmul ----------------------------
    qkv = jax.lax.dot_general(x, wqkv_ref[...], trans_b,
                              preferred_element_type=jnp.float32)
    qkv = qkv + bqkv_ref[...]                                     # [T, C+2*kvf]

    q = qkv[:, :C] * scale        # fold 1/sqrt(hd) into q (smaller than scores)
    k = qkv[:, C:C + kvf]
    v = qkv[:, C + kvf:C + 2 * kvf]

    # ---- causal mask, shared by every kv group ------------------------------
    # Query heads of one kv group are stacked along rows -> [qpk*T, T] scores;
    # row index within each stacked block is (row % T).
    row_t = jax.lax.broadcasted_iota(jnp.int32, (qpk * T, T), 0) % T
    col_t = jax.lax.broadcasted_iota(jnp.int32, (qpk * T, T), 1)
    causal = col_t <= row_t
    neg_big = jnp.float32(-1e30)

    # ---- grouped-query causal attention --------------------------------------
    head_out = [None] * n_head
    for g in range(kv_heads):                       # static, unrolled (2 iters)
        k_g = k[:, g * head_dim:(g + 1) * head_dim]               # [T, hd]
        v_g = v[:, g * head_dim:(g + 1) * head_dim]               # [T, hd]
        q_g = jnp.concatenate(
            [q[:, h * head_dim:(h + 1) * head_dim]
             for h in range(g * qpk, (g + 1) * qpk)], axis=0)     # [qpk*T, hd]

        s = jax.lax.dot_general(q_g, k_g, trans_b,
                                preferred_element_type=jnp.float32)  # [qpk*T, T]
        s = jnp.where(causal, s, neg_big)
        m = jnp.max(s, axis=-1, keepdims=True)
        p = jnp.exp(s - m)                                        # EUP
        denom = jnp.sum(p, axis=-1, keepdims=True)                # XLU reduce
        o_g = jnp.dot(p, v_g, preferred_element_type=jnp.float32)
        o_g = o_g * pl.reciprocal(denom, approx=True)             # divide -> EUP

        for j in range(qpk):
            head_out[g * qpk + j] = o_g[j * T:(j + 1) * T, :]

    attn = jnp.concatenate(head_out, axis=1)                      # [T, C] merged

    # ---- output projection ----------------------------------------------------
    y = jax.lax.dot_general(attn, wc_ref[...], trans_b,
                            preferred_element_type=jnp.float32)
    y = y + bc_ref[...]
    o_ref[0] = y.astype(o_ref.dtype)


# ----------------------------------------------------------------------------
# Forward wrapper
# ----------------------------------------------------------------------------
def grouped_query_forward(x, params, *, n_head, kv_heads):
    B, T, C = x.shape
    hd = C // n_head
    kvf = kv_heads * hd
    cqkv = C + 2 * kvf

    # Fuse the three projection weights once (tiny concat done by XLA).
    wqkv = jnp.concatenate([params["wq"], params["wk"], params["wv"]], axis=0)  # [cqkv, C]
    bqkv = jnp.concatenate([params["bq"], params["bk"], params["bv"]]).reshape(1, cqkv)
    wc = params["wc"]                                                           # [C, C]
    bc = params["bc"].reshape(1, C)

    kernel = functools.partial(_fused_gqa_kernel, n_head=n_head,
                               kv_heads=kv_heads, head_dim=hd)
    y = pl.pallas_call(
        kernel,
        out_shape=jax.ShapeDtypeStruct((B, T, C), x.dtype),
        grid=(B,),
        in_specs=[
            pl.BlockSpec((1, T, C), lambda b: (b, 0, 0)),     # x: one batch/step
            pl.BlockSpec((cqkv, C), lambda b: (0, 0)),        # Wqkv (stays resident)
            pl.BlockSpec((1, cqkv), lambda b: (0, 0)),        # bqkv
            pl.BlockSpec((C, C), lambda b: (0, 0)),           # Wc
            pl.BlockSpec((1, C), lambda b: (0, 0)),           # bc
        ],
        out_specs=pl.BlockSpec((1, T, C), lambda b: (b, 0, 0)),
        compiler_params=pltpu.CompilerParams(
            dimension_semantics=("parallel",)),               # batches independent
    )(x, wqkv, bqkv, wc, bc)

    # Reference forward's verbatim trailing
    # `y.transpose(1, 2).contiguous().view(B, T, C)` — pure index shuffle.
    return jnp.swapaxes(y, 1, 2).reshape(B, T, C)


def init_params(key, n_embd, n_head, kv_heads):
    kv_factor = kv_heads * (n_embd // n_head)
    ks = jax.random.split(key, 8)
    s = 0.02
    return {
        "wq": s * jax.random.normal(ks[0], (n_embd, n_embd), jnp.float32),
        "bq": s * jax.random.normal(ks[1], (n_embd,), jnp.float32),
        "wk": s * jax.random.normal(ks[2], (kv_factor, n_embd), jnp.float32),
        "bk": s * jax.random.normal(ks[3], (kv_factor,), jnp.float32),
        "wv": s * jax.random.normal(ks[4], (kv_factor, n_embd), jnp.float32),
        "bv": s * jax.random.normal(ks[5], (kv_factor,), jnp.float32),
        "wc": s * jax.random.normal(ks[6], (n_embd, n_embd), jnp.float32),
        "bc": s * jax.random.normal(ks[7], (n_embd,), jnp.float32),
    }


# Pure-JAX reference of the same forward (for an in-script numerical check).
def _reference_forward(x, params, *, n_head, kv_heads):
    B, T, C = x.shape
    hd = C // n_head
    qpk = n_head // kv_heads
    q = x @ params["wq"].T + params["bq"]
    k = x @ params["wk"].T + params["bk"]
    v = x @ params["wv"].T + params["bv"]
    q = jnp.transpose(q.reshape(B, T, n_head, hd), (0, 2, 1, 3))
    k = jnp.repeat(jnp.transpose(k.reshape(B, T, kv_heads, hd), (0, 2, 1, 3)), qpk, axis=1)
    v = jnp.repeat(jnp.transpose(v.reshape(B, T, kv_heads, hd), (0, 2, 1, 3)), qpk, axis=1)
    s = jnp.einsum("bhqd,bhkd->bhqk", q, k) / jnp.sqrt(jnp.float32(hd))
    mask = jnp.tril(jnp.ones((T, T), dtype=bool))
    s = jnp.where(mask, s, -jnp.inf)
    p = jax.nn.softmax(s, axis=-1)
    o = jnp.einsum("bhqk,bhkd->bhqd", p, v)
    o = jnp.transpose(o, (0, 2, 1, 3)).reshape(B, T, C)
    y = o @ params["wc"].T + params["bc"]
    return jnp.swapaxes(y, 1, 2).reshape(B, T, C)


if __name__ == "__main__":
    # Module config: n_embedding=32, n_head=4, kv_heads=2, block_size=8,
    # bias=True, dropout=0.0 (inference -> no dropout applied).
    n_embd, n_head, kv_heads, block_size = 32, 4, 2, 8
    B, T = 2, block_size

    key = jax.random.PRNGKey(0)
    kx, kp = jax.random.split(key)
    x = jax.random.normal(kx, (B, T, n_embd), jnp.float32)
    params = init_params(kp, n_embd, n_head, kv_heads)

    fwd = jax.jit(functools.partial(grouped_query_forward,
                                    n_head=n_head, kv_heads=kv_heads))
    y = fwd(x, params)
    jax.block_until_ready(y)
    assert y.shape == (B, T, n_embd)

    # Numerical self-check against the pure-JAX reference (tolerance leaves
    # headroom for the approximate EUP reciprocal in the softmax denominator).
    y_ref = _reference_forward(x, params, n_head=n_head, kv_heads=kv_heads)
    max_err = float(jnp.max(jnp.abs(y - y_ref)))
    assert max_err < 2e-3, f"max abs error {max_err}"

    print("KERNEL_OK")
</pallas_src>

<mosaic_0001>
module attributes {stable_mosaic.version = 11 : i64} {
  func.func @_fused_gqa_kernel(%arg0: i32, %arg1: memref<1x8x32xf32, #tpu.memory_space<vmem>>, %arg2: memref<64x32xf32, #tpu.memory_space<vmem>>, %arg3: memref<1x64xf32, #tpu.memory_space<vmem>>, %arg4: memref<32x32xf32, #tpu.memory_space<vmem>>, %arg5: memref<1x32xf32, #tpu.memory_space<vmem>>, %arg6: memref<1x8x32xf32, #tpu.memory_space<vmem>>) attributes {dimension_semantics = [#tpu.dimension_semantics<parallel>], iteration_bounds = array<i64: 2>, scalar_prefetch = 0 : i64, scratch_operands = 0 : i64, tpu.core_type = #tpu.core_type<tc>, window_params = [{transform_indices = @transform_0, window_bounds = array<i64: 1, 8, 32>}, {pipeline_mode = #tpu.pipeline_mode<synchronous>, transform_indices = @transform_1, window_bounds = array<i64: 64, 32>}, {pipeline_mode = #tpu.pipeline_mode<synchronous>, transform_indices = @transform_2, window_bounds = array<i64: 1, 64>}, {pipeline_mode = #tpu.pipeline_mode<synchronous>, transform_indices = @transform_3, window_bounds = array<i64: 32, 32>}, {pipeline_mode = #tpu.pipeline_mode<synchronous>, transform_indices = @transform_4, window_bounds = array<i64: 1, 32>}, {transform_indices = @transform_5, window_bounds = array<i64: 1, 8, 32>}]} {
    %c0 = arith.constant 0 : index
    %c0_0 = arith.constant 0 : index
    %c0_1 = arith.constant 0 : index
    %0 = vector.load %arg1[%c0, %c0_0, %c0_1] : memref<1x8x32xf32, #tpu.memory_space<vmem>>, vector<1x8x32xf32>
    %1 = vector.shape_cast %0 : vector<1x8x32xf32> to vector<8x32xf32>
    %c0_2 = arith.constant 0 : index
    %c0_3 = arith.constant 0 : index
    %2 = vector.load %arg2[%c0_2, %c0_3] : memref<64x32xf32, #tpu.memory_space<vmem>>, vector<64x32xf32>
    %cst = arith.constant dense<0.000000e+00> : vector<8x64xf32>
    %3 = tpu.matmul %1, %2, %cst {dimension_numbers = #tpu.dot_dimension_numbers<[1], [1], [0], [0], [0, 0, 1, 0], [], []>} : vector<8x32xf32>, vector<64x32xf32>, vector<8x64xf32> -> vector<8x64xf32>
    %c0_4 = arith.constant 0 : index
    %c0_5 = arith.constant 0 : index
    %4 = vector.load %arg3[%c0_4, %c0_5] : memref<1x64xf32, #tpu.memory_space<vmem>>, vector<1x64xf32>
    %5 = vector.broadcast %4 : vector<1x64xf32> to vector<8x64xf32>
    %6 = arith.addf %3, %5 : vector<8x64xf32>
    %7 = vector.extract_strided_slice %6 {offsets = [0, 0], sizes = [8, 32], strides = [1, 1]} : vector<8x64xf32> to vector<8x32xf32>
    %cst_6 = arith.constant 0.353553385 : f32
    %8 = vector.broadcast %cst_6 : f32 to vector<8x32xf32>
    %9 = arith.mulf %7, %8 : vector<8x32xf32>
    %10 = vector.extract_strided_slice %6 {offsets = [0, 32], sizes = [8, 16], strides = [1, 1]} : vector<8x64xf32> to vector<8x16xf32>
    %11 = vector.extract_strided_slice %6 {offsets = [0, 48], sizes = [8, 16], strides = [1, 1]} : vector<8x64xf32> to vector<8x16xf32>
    %12 = tpu.iota {dimensions = array<i32: 0>} : vector<16x8xi32>
    %c8_i32 = arith.constant 8 : i32
    %c0_i32 = arith.constant 0 : i32
    %13 = arith.cmpi eq, %c8_i32, %c0_i32 : i32
    %c1_i32 = arith.constant 1 : i32
    %14 = arith.select %13, %c1_i32, %c8_i32 : i32
    %15 = vector.broadcast %14 : i32 to vector<16x8xi32>
    %16 = arith.remsi %12, %15 : vector<16x8xi32>
    %c0_i32_7 = arith.constant 0 : i32
    %17 = vector.broadcast %c0_i32_7 : i32 to vector<16x8xi32>
    %18 = arith.cmpi ne, %16, %17 : vector<16x8xi32>
    %c0_i32_8 = arith.constant 0 : i32
    %19 = vector.broadcast %c0_i32_8 : i32 to vector<16x8xi32>
    %20 = arith.cmpi slt, %16, %19 : vector<16x8xi32>
    %c0_i32_9 = arith.constant 0 : i32
    %21 = arith.cmpi slt, %14, %c0_i32_9 : i32
    %22 = vector.broadcast %21 : i1 to vector<16x8xi1>
    %23 = vector.broadcast %22 : vector<16x8xi1> to vector<16x8xi1>
    %24 = arith.xori %20, %23 : vector<16x8xi1>
    %25 = arith.andi %24, %18 : vector<16x8xi1>
    %26 = vector.broadcast %14 : i32 to vector<16x8xi32>
    %27 = arith.addi %16, %26 : vector<16x8xi32>
    %28 = arith.select %25, %27, %16 : vector<16x8xi1>, vector<16x8xi32>
    %29 = tpu.iota {dimensions = array<i32: 1>} : vector<16x8xi32>
    %30 = arith.cmpi sle, %29, %28 : vector<16x8xi32>
    %31 = vector.extract_strided_slice %10 {offsets = [0, 0], sizes = [8, 8], strides = [1, 1]} : vector<8x16xf32> to vector<8x8xf32>
    %32 = vector.extract_strided_slice %11 {offsets = [0, 0], sizes = [8, 8], strides = [1, 1]} : vector<8x16xf32> to vector<8x8xf32>
    %33 = vector.extract_strided_slice %9 {offsets = [0, 0], sizes = [8, 8], strides = [1, 1]} : vector<8x32xf32> to vector<8x8xf32>
    %34 = vector.extract_strided_slice %9 {offsets = [0, 8], sizes = [8, 8], strides = [1, 1]} : vector<8x32xf32> to vector<8x8xf32>
    %35 = tpu.concatenate %33, %34 in 0 : vector<8x8xf32>, vector<8x8xf32> -> vector<16x8xf32>
    %cst_10 = arith.constant dense<0.000000e+00> : vector<16x8xf32>
    %36 = tpu.matmul %35, %31, %cst_10 {dimension_numbers = #tpu.dot_dimension_numbers<[1], [1], [0], [0], [0, 0, 1, 0], [], []>} : vector<16x8xf32>, vector<8x8xf32>, vector<16x8xf32> -> vector<16x8xf32>
    %cst_11 = arith.constant -1.000000e+30 : f32
    %37 = vector.broadcast %cst_11 : f32 to vector<16x8xf32>
    %38 = arith.select %30, %36, %37 : vector<16x8xi1>, vector<16x8xf32>
    %cst_12 = arith.constant dense<0xFF800000> : vector<16xf32>
    %39 = vector.multi_reduction <maximumf>, %38, %cst_12 [1] : vector<16x8xf32> to vector<16xf32>
    %40 = vector.shape_cast %39 : vector<16xf32> to vector<16x1xf32>
    %41 = vector.broadcast %40 : vector<16x1xf32> to vector<16x8xf32>
    %42 = arith.subf %38, %41 : vector<16x8xf32>
    %43 = math.exp %42 : vector<16x8xf32>
    %cst_13 = arith.constant dense<0.000000e+00> : vector<16xf32>
    %44 = vector.multi_reduction <add>, %43, %cst_13 [1] : vector<16x8xf32> to vector<16xf32>
    %45 = vector.shape_cast %44 : vector<16xf32> to vector<16x1xf32>
    %cst_14 = arith.constant dense<0.000000e+00> : vector<16x8xf32>
    %46 = tpu.matmul %43, %32, %cst_14 {dimension_numbers = #tpu.dot_dimension_numbers<[1], [0], [0], [1], [0, 0, 1, 1], [], []>} : vector<16x8xf32>, vector<8x8xf32>, vector<16x8xf32> -> vector<16x8xf32>
    %47 = tpu.reciprocal %45 {approx = true} : vector<16x1xf32> -> vector<16x1xf32>
    %48 = vector.broadcast %47 : vector<16x1xf32> to vector<16x8xf32>
    %49 = arith.mulf %46, %48 : vector<16x8xf32>
    %50 = vector.extract_strided_slice %49 {offsets = [0, 0], sizes = [8, 8], strides = [1, 1]} : vector<16x8xf32> to vector<8x8xf32>
    %51 = vector.extract_strided_slice %49 {offsets = [8, 0], sizes = [8, 8], strides = [1, 1]} : vector<16x8xf32> to vector<8x8xf32>
    %52 = vector.extract_strided_slice %10 {offsets = [0, 8], sizes = [8, 8], strides = [1, 1]} : vector<8x16xf32> to vector<8x8xf32>
    %53 = vector.extract_strided_slice %11 {offsets = [0, 8], sizes = [8, 8], strides = [1, 1]} : vector<8x16xf32> to vector<8x8xf32>
    %54 = vector.extract_strided_slice %9 {offsets = [0, 16], sizes = [8, 8], strides = [1, 1]} : vector<8x32xf32> to vector<8x8xf32>
    %55 = vector.extract_strided_slice %9 {offsets = [0, 24], sizes = [8, 8], strides = [1, 1]} : vector<8x32xf32> to vector<8x8xf32>
    %56 = tpu.concatenate %54, %55 in 0 : vector<8x8xf32>, vector<8x8xf32> -> vector<16x8xf32>
    %cst_15 = arith.constant dense<0.000000e+00> : vector<16x8xf32>
    %57 = tpu.matmul %56, %52, %cst_15 {dimension_numbers = #tpu.dot_dimension_numbers<[1], [1], [0], [0], [0, 0, 1, 0], [], []>} : vector<16x8xf32>, vector<8x8xf32>, vector<16x8xf32> -> vector<16x8xf32>
    %cst_16 = arith.constant -1.000000e+30 : f32
    %58 = vector.broadcast %cst_16 : f32 to vector<16x8xf32>
    %59 = arith.select %30, %57, %58 : vector<16x8xi1>, vector<16x8xf32>
    %cst_17 = arith.constant dense<0xFF800000> : vector<16xf32>
    %60 = vector.multi_reduction <maximumf>, %59, %cst_17 [1] : vector<16x8xf32> to vector<16xf32>
    %61 = vector.shape_cast %60 : vector<16xf32> to vector<16x1xf32>
    %62 = vector.broadcast %61 : vector<16x1xf32> to vector<16x8xf32>
    %63 = arith.subf %59, %62 : vector<16x8xf32>
    %64 = math.exp %63 : vector<16x8xf32>
    %cst_18 = arith.constant dense<0.000000e+00> : vector<16xf32>
    %65 = vector.multi_reduction <add>, %64, %cst_18 [1] : vector<16x8xf32> to vector<16xf32>
    %66 = vector.shape_cast %65 : vector<16xf32> to vector<16x1xf32>
    %cst_19 = arith.constant dense<0.000000e+00> : vector<16x8xf32>
    %67 = tpu.matmul %64, %53, %cst_19 {dimension_numbers = #tpu.dot_dimension_numbers<[1], [0], [0], [1], [0, 0, 1, 1], [], []>} : vector<16x8xf32>, vector<8x8xf32>, vector<16x8xf32> -> vector<16x8xf32>
    %68 = tpu.reciprocal %66 {approx = true} : vector<16x1xf32> -> vector<16x1xf32>
    %69 = vector.broadcast %68 : vector<16x1xf32> to vector<16x8xf32>
    %70 = arith.mulf %67, %69 : vector<16x8xf32>
    %71 = vector.extract_strided_slice %70 {offsets = [0, 0], sizes = [8, 8], strides = [1, 1]} : vector<16x8xf32> to vector<8x8xf32>
    %72 = vector.extract_strided_slice %70 {offsets = [8, 0], sizes = [8, 8], strides = [1, 1]} : vector<16x8xf32> to vector<8x8xf32>
    %73 = tpu.concatenate %50, %51, %71, %72 in 1 : vector<8x8xf32>, vector<8x8xf32>, vector<8x8xf32>, vector<8x8xf32> -> vector<8x32xf32>
    %c0_20 = arith.constant 0 : index
    %c0_21 = arith.constant 0 : index
    %74 = vector.load %arg4[%c0_20, %c0_21] : memref<32x32xf32, #tpu.memory_space<vmem>>, vector<32x32xf32>
    %cst_22 = arith.constant dense<0.000000e+00> : vector<8x32xf32>
    %75 = tpu.matmul %73, %74, %cst_22 {dimension_numbers = #tpu.dot_dimension_numbers<[1], [1], [0], [0], [0, 0, 1, 0], [], []>} : vector<8x32xf32>, vector<32x32xf32>, vector<8x32xf32> -> vector<8x32xf32>
    %c0_23 = arith.constant 0 : index
    %c0_24 = arith.constant 0 : index
    %76 = vector.load %arg5[%c0_23, %c0_24] : memref<1x32xf32, #tpu.memory_space<vmem>>, vector<1x32xf32>
    %77 = vector.broadcast %76 : vector<1x32xf32> to vector<8x32xf32>
    %78 = arith.addf %75, %77 : vector<8x32xf32>
    %c0_25 = arith.constant 0 : index
    %c0_26 = arith.constant 0 : index
    %c0_27 = arith.constant 0 : index
    %79 = vector.load %arg6[%c0_25, %c0_26, %c0_27] : memref<1x8x32xf32, #tpu.memory_space<vmem>>, vector<1x8x32xf32>
    %80 = vector.shape_cast %79 : vector<1x8x32xf32> to vector<8x32xf32>
    %81 = vector.shape_cast %78 : vector<8x32xf32> to vector<1x8x32xf32>
    tpu.vector_store %arg6[%c0_25, %c0_26, %c0_27], %81 {strides = array<i32>} : memref<1x8x32xf32, #tpu.memory_space<vmem>>, vector<1x8x32xf32>,
    return
  }
  func.func @transform_0(%arg0: i32) -> (i32, i32, i32) {
    %c0_i32 = arith.constant 0 : i32
    %c0_i32_0 = arith.constant 0 : i32
    %c0_i32_1 = arith.constant 0 : i32
    return %arg0, %c0_i32, %c0_i32_0 : i32, i32, i32
  }
  func.func @transform_1(%arg0: i32) -> (i32, i32) {
    %c0_i32 = arith.constant 0 : i32
    %c0_i32_0 = arith.constant 0 : i32
    %c0_i32_1 = arith.constant 0 : i32
    return %c0_i32, %c0_i32_0 : i32, i32
  }
  func.func @transform_2(%arg0: i32) -> (i32, i32) {
    %c0_i32 = arith.constant 0 : i32
    %c0_i32_0 = arith.constant 0 : i32
    %c0_i32_1 = arith.constant 0 : i32
    return %c0_i32, %c0_i32_0 : i32, i32
  }
  func.func @transform_3(%arg0: i32) -> (i32, i32) {
    %c0_i32 = arith.constant 0 : i32
    %c0_i32_0 = arith.constant 0 : i32
    %c0_i32_1 = arith.constant 0 : i32
    return %c0_i32, %c0_i32_0 : i32, i32
  }
  func.func @transform_4(%arg0: i32) -> (i32, i32) {
    %c0_i32 = arith.constant 0 : i32
    %c0_i32_0 = arith.constant 0 : i32
    %c0_i32_1 = arith.constant 0 : i32
    return %c0_i32, %c0_i32_0 : i32, i32
  }
  func.func @transform_5(%arg0: i32) -> (i32, i32, i32) {
    %c0_i32 = arith.constant 0 : i32
    %c0_i32_0 = arith.constant 0 : i32
    %c0_i32_1 = arith.constant 0 : i32
    return %arg0, %c0_i32, %c0_i32_0 : i32, i32, i32
  }
}

</mosaic_0001>

<bundles_post_ra>
// kernel: grouped_query_forward.1
= control target key start
LH: loop header
LB: loop body
LE: loop exit
PB: predicated region body
PF: predicated region fallthrough
CT: control target
= control target key end

     0   :  { %s1145_s18 = smov 0   ;;  %s1293_s0 = inlined_call_operand.vmem [shape: f32[2,8,32], index: 0, kind: input, shape index: {}]   ;;  %s1294_s1 = inlined_call_operand.vmem [shape: f32[64,32], index: 1, kind: input, shape index: {}]   ;;  %s1295_s2 = inlined_call_operand.vmem [shape: f32[1,64], index: 2, kind: input, shape index: {}]   ;;  %s1296_s3 = inlined_call_operand.vmem [shape: f32[32,32], index: 3, kind: input, shape index: {}]   ;;  %s1297_s4 = inlined_call_operand.vmem [shape: f32[1,32], index: 4, kind: input, shape index: {}]   ;;  %s1298_s5 = inlined_call_operand.vmem [shape: f32[2,8,32], index: 5, kind: output, shape index: {}]  }
   0x1 LB: > { %s924_s19 = sadd.s32 4294967295, %s1101_s18   ;;  %p928_p0 = scmp.ge.s32.totalorder %s1101_s18, 1  ;;  %s1101_s18 = sphi %s1145_s18, %s15_s18  }
   0x2   : > { %p186_p1 = scmp.lt.s32.totalorder %s1101_s18, 3 }
   0x4   : > { %p187_p2 = pnand %p928_p0, %p186_p1 }
   0x5   : > { %v221_v0 = vld [vmem:[%s1294_s1] sm:$0xff] (!%p187_p2)  ;;  %v222_v1 = vld [vmem:[%s1294_s1 + $0x8] sm:$0xff] (!%p187_p2)  ;;  %vm236_vm0 = vcmask (!%p187_p2), 261120   ;;  %v1103_v2 = vmov (!%p187_p2), 0.0|0.0   ;;  %vm1104_vm2 = vmmov (!%p187_p2), 0   ;;  %v1105_v5 = vmov (!%p187_p2), 0.0  }
   0x6   : > { %190 = sbr.rel (%p187_p2) target bundleno = 1675 (0x68b), region = 40  ;;  %1035 = vmatprep.subr.bf16.mxu0 (!%p187_p2), %v1103_v2  ;;  %v1036_v3 = vpack.c.bf16 (!%p187_p2), %v222_v1, %v221_v0  ;;  %vm1162_vm1 = vmpackc.low (!%p187_p2), %vm236_vm0, %vm236_vm0  ;;  %1001 = vmatprep.mubr.msk.f32.mxu0 (!%p187_p2), %vm1104_vm2, %v1105_v5  ;;  %v223_v6 = vld [vmem:[%s1294_s1 + $0x10] sm:$0xff] (!%p187_p2)  ;;  %v224_v7 = vld [vmem:[%s1294_s1 + $0x18] sm:$0xff] (!%p187_p2)  ;;  %p212_p3 = scmp.lt.s32.totalorder (!%p187_p2), %s924_s19, 1  ;;  %vm372_vm3 = vcmask (!%p187_p2), 64512   ;;  %v335_v24 = vlaneseq (!%p187_p2)  ;;  %vm770_vm6 = vcmask (!%p187_p2), 130048  }
   0x7   : > { %v1040_v8 = vpack.c.bf16 (!%p187_p2), %v224_v7, %v223_v6  ;;  %v225_v9 = vld [vmem:[%s1294_s1 + $0x20] sm:$0xff] (!%p187_p2)  ;;  %v226_v10 = vld [vmem:[%s1294_s1 + $0x28] sm:$0xff] (!%p187_p2)  ;;  %v227_v12 = vld [vmem:[%s1294_s1 + $0x30] sm:$0xff] (!%p187_p2)  ;;  %s1106_s17 = smov (!%p187_p2), 96   ;;  %s1107_s20 = smov (!%p187_p2), 120   ;;  %vm772_vm7 = vcmask (!%p187_p2), 195584  }
   0x8   : > { %1038 = vmatpush3.bf16.xpose.msk.msra.mxu0 (!%p187_p2), %vm1162_vm1, %v1036_v3  ;;  %v1044_v11 = vpack.c.bf16 (!%p187_p2), %v226_v10, %v225_v9  ;;  %v228_v13 = vld [vmem:[%s1294_s1 + $0x38] sm:$0xff] (!%p187_p2)  ;;  %v931_v16 = vld [vmem:[%s1295_s2] ss:$0 sm:$0xff] (!%p187_p2)  ;;  %s1108_s21 = smov (!%p187_p2), 80   ;;  %s1109_s22 = smov (!%p187_p2), 112   ;;  %v336_v25 = vshrl.u32 (!%p187_p2), %v335_v24, 7 }
   0x9   : > { %1039 = vmatprep.subr.bf16.mxu0 (!%p187_p2), %v1103_v2  ;;  %v1048_v14 = vpack.c.bf16 (!%p187_p2), %v228_v13, %v227_v12  ;;  %v363_v28 = vand.u32 (!%p187_p2), 127, %v335_v24  ;;  %s1110_s23 = smov (!%p187_p2), 88   ;;  %s1111_s24 = smov (!%p187_p2), 72   ;;  %v774_v12 = vld [vmem:[%s1296_s3] sm:$0xff] (!%p187_p2)  ;;  %v775_v13 = vld [vmem:[%s1296_s3 + $0x8] sm:$0xff] (!%p187_p2) }
   0xa   : > { %v337_v26 = vadd.s32 (!%p187_p2), 8, %v336_v25  ;;  %v342_v29 = vand.u32 (!%p187_p2), 7, %v336_v25  ;;  %s1112_s25 = smov (!%p187_p2), 8   ;;  %s1113_s9 = smov (!%p187_p2), 16   ;;  %v951_v32 = vld [vmem:[%s1297_s4] ss:$0 sm:$0xff] (!%p187_p2) }
   0xb   : > { %s1114_s10 = smov (!%p187_p2), 24  }
   0xc   : > { %v349_v27 = vand.u32 (!%p187_p2), 7, %v337_v26  ;;  %vm1226_vm5 = vcmp.le.s32.totalorder (!%p187_p2), %v363_v28, %v342_v29 }
   0xd   : > { %s1306_s19 = smov (!%p212_p3, %s924_s19), 1 }
   0xe   : > { %s929_s11 = sshll.u32 %s1306_s19, 3  ;;  %vm1222_vm4 = vcmp.le.s32.totalorder %v363_v28, %v349_v27 }
   0xf   : > { %s215_s14 = scalar_lea.vmem %s1293_s0, %s929_s11  ;;  %s219_s16 = scalar_lea.vmem %s1298_s5, %s929_s11 }
  0x10   : > { %1042 = vmatpush3.bf16.xpose.msk.msra.mxu0 %vm1162_vm1, %v1040_v8  ;;  %v220_v15 = vld [vmem:[%s215_s14] sm:$0xff] }
  0x11   : > { %1043 = vmatprep.subr.bf16.mxu0 %v1103_v2 }
  0x18   : > { %1046 = vmatpush3.bf16.xpose.msk.msra.mxu0 %vm1162_vm1, %v1044_v11 }
  0x19   : > { %1047 = vmatprep.subr.bf16.mxu0 %v1103_v2 }
  0x20   : > { %1050 = vmatpush3.bf16.xpose.msk.msra.mxu0 %vm1162_vm1, %v1048_v14  ;;  %v1052_v14 = vpack.c.bf16 %v775_v13, %v774_v12 }
  0x27   : > { %1002 = vmatmul.mubr.msk.f32.vlgmr.msra.gmra.mrb[0].mxu0 %vm236_vm0, %v220_v15  ;;  %v777_v15 = vld [vmem:[%s1296_s3 + $0x18] sm:$0xff] }
  0xfa   : > { %v330_v17 = vpop.f32.mrb[0].mxu0 }
  0xfb   : > { %v1213_v18 = vadd.f32 %v931_v16, %v330_v17  ;;  %v1003_v19 = vpop.f32.mrb[1].mxu0 }
  0xfd   : > { %370 = vrot.lane.b32.xlu0 %v1213_v18, %s1106_s17  ;;  %v334_v20 = vmul.f32 0.35355338, %v1213_v18 }
  0xff   : > { %1006 = vmatprep.mubr.msk.f32.mxu1 %vm372_vm3, %v334_v20 }
 0x101   : > { %367 = vrot.lane.b32.xlu0 %v334_v20, %s1107_s20 }
 0x105   : > { %474 = vrot.lane.b32.xlu0 %v1213_v18, %s1108_s21 }
 0x109   : > { %562 = vrot.lane.b32.xlu0 %v334_v20, %s1109_s22 }
 0x16f   : > { %v371_v21 = vpop.permute.xlu0 %370 }
 0x170   : > { %1004 = vmatprep.subr.msk.mxu1 %vm372_vm3, %v371_v21 }
 0x171   : > { %1005 = vmatpush3.xpose.msk.msra.mxu1 %vm372_vm3, %v371_v21 }
 0x173   : > { %v368_v22 = vpop.permute.xlu0 %367 }
 0x174   : > { %564 = vrot.lane.b32.xlu0 %v368_v22, %s1109_s22  ;;  %1007 = vmatmul.mubr.msk.f32.vlgmr.msra.gmra.mrb[0].mxu1 %vm372_vm3, %v368_v22 }
 0x177   : > { %v475_v23 = vpop.permute.xlu0 %474 }
 0x178   : > { %1009 = vmatprep.subr.mxu1 %v475_v23 }
 0x179   : > { %1010 = vmatpush3.msra.mxu1 %v475_v23 }
 0x17b   : > { %v563_v47 = vpop.permute.xlu0 %562 }
 0x1e6   : > { %v565_v48 = vpop.permute.xlu0 %564 }
 0x247   : > { %v1008_v31 = vpop.f32.mrb[0].mxu1 }
 0x248   : > { %v455_v33 = vsel %vm1222_vm4, %v1008_v31, -1e+30  ;;  %v445_v34 = vpop.f32.mrb[1].mxu1 }
 0x249   : > { %v459_v35 = vsel %vm372_vm3, %v455_v33, -inf  ;;  %v454_v36 = vsel %vm1226_vm5, %v445_v34, -1e+30 }
 0x24a   : > { %460 = vmax.xlane.f32.xlu1 %v459_v35  ;;  %v456_v37 = vsel %vm372_vm3, %v454_v36, -inf }
 0x24e   : > { %457 = vmax.xlane.f32.xlu1 %v456_v37 }
 0x25f   : > { %566 = vrot.lane.b32.xlu1 %v1213_v18, %s1110_s23 }
 0x2d7   : > { %v461_v38 = vpop.xlane.xlu1 %460 }
 0x2d8   : > { %v463_v39 = vsub.f32 %v455_v33, %v461_v38 }
 0x2da   : > { %v466_v42 = vmul.f32 1.442695, %v463_v39 }
 0x2db   : > { %v458_v40 = vpop.xlane.xlu1 %457 }
 0x2dc   : > { %v462_v41 = vsub.f32 %v454_v36, %v458_v40 }
 0x2de   : > { %v464_v43 = vmul.f32 1.442695, %v462_v41 }
 0x2df   : > { %v567_v44 = vpop.permute.xlu1 %566 }
 0x2e0   : > { %1079 = vpow2.f32 %v464_v43  ;;  %1014 = vmatprep.subr.msk.mxu1 %vm372_vm3, %v567_v44 }
 0x2e1   : > { %1081 = vpow2.f32 %v466_v42 }
 0x2ea   : > { %v1080_v45 = vpop.eup %1079 }
 0x2eb   : > { %v1082_v46 = vpop.eup %1081  ;;  %1011 = vmatprep.mubr.msk.f32.mxu1 %vm372_vm3, %v1080_v45  ;;  %v468_v58 = vsel %vm372_vm3, %v1080_v45, 0.0 }
 0x2ec   : > { %1012 = vmatmul.mubr.msk.f32.vlgmr.msra.gmra.mrb[2].mxu1 %vm372_vm3, %v1082_v46  ;;  %v471_v57 = vsel %vm372_vm3, %v1082_v46, 0.0 }
 0x2ed   : > { %1015 = vmatpush3.xpose.msk.msra.mxu1 %vm372_vm3, %v567_v44  ;;  %1016 = vmatprep.mubr.msk.f32.mxu1 %vm372_vm3, %v563_v47 }
 0x2f0   : > { %1017 = vmatmul.mubr.msk.f32.vlgmr.msra.gmra.mrb[4].mxu1 %vm372_vm3, %v565_v48 }
 0x3bf   : > { %v1013_v49 = vpop.f32.mrb[2].mxu1 }
 0x3c0   : > { %v1243_v50 = vpop.f32.mrb[3].mxu1 }
 0x3c3   : > { %v1018_v51 = vpop.f32.mrb[4].mxu1 }
 0x3c4   : > { %v650_v52 = vsel %vm1222_vm4, %v1018_v51, -1e+30  ;;  %v640_v53 = vpop.f32.mrb[5].mxu1 }
 0x3c5   : > { %v649_v54 = vsel %vm1226_vm5, %v640_v53, -1e+30  ;;  %v654_v55 = vsel %vm372_vm3, %v650_v52, -inf }
 0x3c6   : > { %655 = vmax.xlane.f32.xlu1 %v654_v55  ;;  %v651_v56 = vsel %vm372_vm3, %v649_v54, -inf }
 0x3c7   : > { %652 = vmax.xlane.f32.xlu0 %v651_v56 }
 0x3ca   : > { %472 = vadd.xlane.f32.xlu1 %v471_v57 }
 0x3dd   : > { %669 = vrot.lane.b32.xlu0 %v1213_v18, %s1111_s24 }
 0x3fc   : > { %469 = vadd.xlane.f32.xlu0 %v468_v58 }
 0x453   : > { %v656_v59 = vpop.xlane.xlu1 %655 }
 0x454   : > { %v658_v60 = vsub.f32 %v650_v52, %v656_v59  ;;  %v653_v61 = vpop.xlane.xlu0 %652 }
 0x455   : > { %v657_v62 = vsub.f32 %v649_v54, %v653_v61 }
 0x456   : > { %v661_v63 = vmul.f32 1.442695, %v658_v60 }
 0x457   : > { %v659_v0 = vmul.f32 1.442695, %v657_v62  ;;  %v473_v8 = vpop.xlane.xlu1 %472 }
 0x458   : > { %v670_v1 = vpop.permute.xlu0 %669 }
 0x459   : > { %1083 = vpow2.f32 %v659_v0  ;;  %1019 = vmatprep.subr.mxu1 %v670_v1 }
 0x45a   : > { %1085 = vpow2.f32 %v661_v63  ;;  %1020 = vmatpush3.msra.mxu1 %v670_v1 }
 0x45b   : > { %1051 = vmatprep.subr.bf16.mxu1 %v1103_v2  ;;  %1087 = vrcp.f32 %v473_v8 }
 0x463   : > { %v1084_v3 = vpop.eup %1083 }
 0x464   : > { %v1086_v6 = vpop.eup %1085  ;;  %1021 = vmatprep.mubr.msk.f32.mxu1 %vm372_vm3, %v1084_v3  ;;  %v663_v7 = vsel %vm372_vm3, %v1084_v3, 0.0 }
 0x465   : > { %664 = vadd.xlane.f32.xlu1 %v663_v7  ;;  %1022 = vmatmul.mubr.msk.f32.vlgmr.msra.gmra.mrb[6].mxu1 %vm372_vm3, %v1086_v6  ;;  %v666_v9 = vsel %vm372_vm3, %v1086_v6, 0.0  ;;  %v1088_v10 = vpop.eup %1087 }
 0x466   : > { %1032 = vmatprep.mubr.msk.f32.mxu1 %vm1104_vm2, %v1105_v5  ;;  %v561_v11 = vmul.f32 %v1088_v10, %v1013_v49  ;;  %1054 = vmatpush3.bf16.xpose.msk.msra.mxu1 %vm1162_vm1, %v1052_v14  ;;  %v776_v5 = vld [vmem:[%s1296_s3 + $0x10] sm:$0xff] }
 0x467   : > { %1055 = vmatprep.subr.bf16.mxu1 %v1103_v2  ;;  %v1056_v16 = vpack.c.bf16 %v777_v15, %v776_v5 }
 0x469   : > { %667 = vadd.xlane.f32.xlu1 %v666_v9 }
 0x46e   : > { %1058 = vmatpush3.bf16.xpose.msk.msra.mxu1 %vm1162_vm1, %v1056_v16 }
 0x47a   : > { %758 = vrot.lane.b32.xlu1 %v561_v11, %s1112_s25 }
 0x489   : > { %v470_v24 = vpop.xlane.xlu0 %469 }
 0x4f2   : > { %v665_v17 = vpop.xlane.xlu1 %664 }
 0x4f3   : > { %1089 = vrcp.f32 %v665_v17 }
 0x4f6   : > { %v668_v18 = vpop.xlane.xlu1 %667 }
 0x4f7   : > { %1091 = vrcp.f32 %v668_v18 }
 0x4f8   : > { %1093 = vrcp.f32 %v470_v24 }
 0x4fa   : > { %v759_v25 = vpop.permute.xlu1 %758 }
 0x4fd   : > { %v1090_v20 = vpop.eup %1089 }
 0x501   : > { %v1092_v22 = vpop.eup %1091 }
 0x502   : > { %v1094_v4 = vpop.eup %1093 }
 0x503   : > { %v560_v27 = vmul.f32 %v1094_v4, %v1243_v50 }
 0x505   : > { %v769_v28 = vsel %vm372_vm3, %v560_v27, %v759_v25 }
 0x538   : > { %v1023_v19 = vpop.f32.mrb[6].mxu1 }
 0x539   : > { %v744_v21 = vpop.f32.mrb[7].mxu1  ;;  %v756_v23 = vmul.f32 %v1092_v22, %v1023_v19 }
 0x53a   : > { %v755_v2 = vmul.f32 %v1090_v20, %v744_v21 }
 0x53c   : > { %762 = vrot.lane.b32.xlu1 %v755_v2, %s1113_s9 }
 0x540   : > { %766 = vrot.lane.b32.xlu1 %v756_v23, %s1114_s10 }
 0x5ae   : > { %v763_v26 = vpop.permute.xlu1 %762 }
 0x5af   : > { %v771_v29 = vsel %vm770_vm6, %v769_v28, %v763_v26 }
 0x5b2   : > { %v767_v30 = vpop.permute.xlu1 %766 }
 0x5b3   : > { %v773_v31 = vsel %vm772_vm7, %v771_v29, %v767_v30 }
 0x5b4   : > { %1033 = vmatmul.mubr.msk.f32.vlgmr.msra.gmra.mrb[8].mxu1 %vm236_vm0, %v773_v31 }
 0x687   : > { %v866_v33 = vpop.f32.mrb[8].mxu1 }
 0x688   : > { %v867_v34 = vadd.f32 %v951_v32, %v866_v33  ;;  %v1034_v35 = vpop.f32.mrb[9].mxu1 }
 0x68a   : > { %870 = vst.msk [vmem:[%s219_s16] sm:$0xff] %vm236_vm0, %v867_v34 }
 0x68b PF: > { %s15_s18 = sadd.s32 1, %s1101_s18  }
 0x68c   : > { %p12_p4 = scmp.ge.s32.totalorder %s15_s18, 4  }
 0x68e   :  { %14 = sbr.rel (!%p12_p4) target bundleno = 1 (0x1), region = 70 }

</bundles_post_ra>
